<compile_context>
chip_gen: v6e
topology: v6e:2x2x1
jax: 0.10.0
libtpu: 0.0.40
codegen_flags: <defaults>
</compile_context>

<pallas_src>
import functools

import jax
import jax.numpy as jnp
from jax import lax
from jax.experimental import pallas as pl
from jax.experimental.pallas import tpu as pltpu


def _projnetx_kernel(x_ref, w_ref, out_ref, xpad_ref, patch_ref,
                     *, H, W, C, T, cen):
    """Fused ProjnetX forward for one batch element.

    x_ref     : (C, H*W)              input activation (NCHW flattened)
    w_ref     : (2*T, C, 9*C+1)       per-conv weight matrices, last column = bias
    out_ref   : (C, H*W)              output activation
    xpad_ref  : (C, 2*cen + H*W)      VMEM scratch: flat activation with halo
    patch_ref : (9*C+1, H*W)          VMEM scratch: im2col patches (+ ones row)
    """
    HW = H * W

    # --- per-step scratch init (cheap, and safe under parallel grid sharding)
    xpad_ref[:, :cen] = jnp.zeros((C, cen), jnp.float32)          # left halo
    xpad_ref[:, cen + HW:] = jnp.zeros((C, cen), jnp.float32)     # right halo
    patch_ref[9 * C:, :] = jnp.ones((1, HW), jnp.float32)         # bias row

    # --- column-boundary masks for the horizontal +/-1 taps (computed once)
    lane = lax.broadcasted_iota(jnp.int32, (C, HW), 1)
    wpos = lane % W
    mask_l = wpos > 0            # valid positions for a dx = -1 tap
    mask_r = wpos < (W - 1)      # valid positions for a dx = +1 tap

    def conv3x3(a, w_mat):
        """a: (C, HW) f32; w_mat: (C, 9*C+1) (bias fused) -> (C, HW) f32."""
        # Write the activation into the centre of the flat padded buffer
        # (128-lane aligned store); the halo strips stay zero.
        xpad_ref[:, cen:cen + HW] = a
        # Build the im2col patch tensor: 9 shifted views of the flat buffer.
        for ky in range(3):
            for kx in range(3):
                off = cen + (ky - 1) * W + (kx - 1)
                sl = xpad_ref[:, off:off + HW]
                if kx == 0:
                    sl = jnp.where(mask_l, sl, 0.0)
                elif kx == 2:
                    sl = jnp.where(mask_r, sl, 0.0)
                tap = ky * 3 + kx
                patch_ref[tap * C:(tap + 1) * C, :] = sl
        # Single MXU push per conv: (C, 9C+1) @ (9C+1, HW).
        return jnp.dot(w_mat, patch_ref[...],
                       preferred_element_type=jnp.float32)

    # --- T residual blocks, activation resident across blocks -------------
    cur = x_ref[...].astype(jnp.float32)
    for t in range(T):
        h = jnp.maximum(conv3x3(cur, w_ref[2 * t]), 0.0)      # conv1 + ReLU
        cur = cur + conv3x3(h, w_ref[2 * t + 1])              # conv2 + residual
    out_ref[...] = cur.astype(out_ref.dtype)


def pack_params(params):
    """params: list of T tuples (w1, b1, w2, b2); w OIHW (C,C,3,3), b (C,).

    Returns (2*T, C, 9*C+1) matrices: row co, col (ky*3+kx)*C + ci, and the
    last column holds the bias (matched in-kernel by a constant ones row).
    """
    mats = []
    for (w1, b1, w2, b2) in params:
        C = w1.shape[0]
        for w, b in ((w1, b1), (w2, b2)):
            m = jnp.transpose(w, (0, 2, 3, 1)).reshape(C, 9 * C)
            mats.append(jnp.concatenate([m, b.reshape(C, 1)], axis=1))
    return jnp.stack(mats, axis=0)


@jax.jit
def projnetx_forward(x_nchw, w_packed):
    """x_nchw: (N, C, H, W) float32; w_packed: (2*T, C, 9*C+1)."""
    N, C, H, W = x_nchw.shape
    T = w_packed.shape[0] // 2
    HW = H * W
    cen = ((W + 1 + 127) // 128) * 128        # 128-aligned halo offset

    kernel = functools.partial(_projnetx_kernel, H=H, W=W, C=C, T=T, cen=cen)

    out = pl.pallas_call(
        kernel,
        out_shape=jax.ShapeDtypeStruct((N, C, HW), x_nchw.dtype),
        grid_spec=pltpu.PrefetchScalarGridSpec(
            num_scalar_prefetch=0,
            grid=(N,),
            in_specs=[
                pl.BlockSpec((pl.Squeezed(), C, HW), lambda n: (n, 0, 0)),
                pl.BlockSpec((2 * T, C, 9 * C + 1), lambda n: (0, 0, 0)),
            ],
            out_specs=pl.BlockSpec((pl.Squeezed(), C, HW), lambda n: (n, 0, 0)),
            scratch_shapes=[
                pltpu.VMEM((C, 2 * cen + HW), jnp.float32),   # padded flat act
                pltpu.VMEM((9 * C + 1, HW), jnp.float32),     # im2col patches
            ],
        ),
        compiler_params=pltpu.CompilerParams(
            dimension_semantics=("parallel",)),
    )(x_nchw.reshape(N, C, HW), w_packed)
    return out.reshape(N, C, H, W)


def _reference_forward(x_nchw, params):
    """Pure-JAX reference (lax.conv, NCHW/OIHW — same convention as nn.Conv2d)."""
    dn = ("NCHW", "OIHW", "NCHW")
    x = x_nchw
    for (w1, b1, w2, b2) in params:
        h = lax.conv_general_dilated(x, w1, (1, 1), "SAME",
                                     dimension_numbers=dn)
        h = jnp.maximum(h + b1.reshape(1, -1, 1, 1), 0.0)
        y = lax.conv_general_dilated(h, w2, (1, 1), "SAME",
                                     dimension_numbers=dn)
        x = x + y + b2.reshape(1, -1, 1, 1)
    return x


if __name__ == "__main__":
    # Small shapes: batch=2, channels=8, spatial=16x16, T=2 residual blocks.
    N, C, H, W, T = 2, 8, 16, 16, 2

    key = jax.random.PRNGKey(0)
    key, xk = jax.random.split(key)
    x = jax.random.normal(xk, (N, C, H, W), dtype=jnp.float32)    # NCHW

    params = []
    for _ in range(T):
        key, k1, k2, k3, k4 = jax.random.split(key, 5)
        w1 = jax.random.normal(k1, (C, C, 3, 3), jnp.float32) * 0.1   # OIHW
        b1 = jax.random.normal(k2, (C,), jnp.float32) * 0.1
        w2 = jax.random.normal(k3, (C, C, 3, 3), jnp.float32) * 0.1
        b2 = jax.random.normal(k4, (C,), jnp.float32) * 0.1
        params.append((w1, b1, w2, b2))

    w_packed = pack_params(params)

    out = jax.block_until_ready(projnetx_forward(x, w_packed))
    ref = _reference_forward(x, params)

    assert out.shape == (N, C, H, W)
    assert jnp.allclose(out, ref, atol=1e-4, rtol=1e-4), "mismatch vs reference"

    print("KERNEL_OK")
</pallas_src>

<mosaic_0001>
module attributes {stable_mosaic.version = 11 : i64} {
  func.func @_projnetx_kernel(%arg0: i32, %arg1: memref<1x8x256xf32, #tpu.memory_space<vmem>>, %arg2: memref<4x8x73xf32, #tpu.memory_space<vmem>>, %arg3: memref<1x8x256xf32, #tpu.memory_space<vmem>>, %arg4: memref<8x512xf32, #tpu.memory_space<vmem>>, %arg5: memref<73x256xf32, #tpu.memory_space<vmem>>) attributes {dimension_semantics = [#tpu.dimension_semantics<parallel>], iteration_bounds = array<i64: 2>, scalar_prefetch = 0 : i64, scratch_operands = 2 : i64, tpu.core_type = #tpu.core_type<tc>, window_params = [{transform_indices = @transform_0, window_bounds = array<i64: 1, 8, 256>}, {pipeline_mode = #tpu.pipeline_mode<synchronous>, transform_indices = @transform_1, window_bounds = array<i64: 4, 8, 73>}, {transform_indices = @transform_2, window_bounds = array<i64: 1, 8, 256>}]} {
    %cst = arith.constant 0.000000e+00 : f32
    %0 = vector.broadcast %cst : f32 to vector<8x128xf32>
    %c0 = arith.constant 0 : index
    %c0_0 = arith.constant 0 : index
    %1 = vector.load %arg4[%c0, %c0_0] : memref<8x512xf32, #tpu.memory_space<vmem>>, vector<8x128xf32>
    tpu.vector_store %arg4[%c0, %c0_0], %0 {strides = array<i32>} : memref<8x512xf32, #tpu.memory_space<vmem>>, vector<8x128xf32>,
    %cst_1 = arith.constant 0.000000e+00 : f32
    %2 = vector.broadcast %cst_1 : f32 to vector<8x128xf32>
    %c0_2 = arith.constant 0 : index
    %c384 = arith.constant 384 : index
    %3 = vector.load %arg4[%c0_2, %c384] : memref<8x512xf32, #tpu.memory_space<vmem>>, vector<8x128xf32>
    tpu.vector_store %arg4[%c0_2, %c384], %2 {strides = array<i32>} : memref<8x512xf32, #tpu.memory_space<vmem>>, vector<8x128xf32>,
    %cst_3 = arith.constant 1.000000e+00 : f32
    %4 = vector.broadcast %cst_3 : f32 to vector<1x256xf32>
    %c72 = arith.constant 72 : index
    %c0_4 = arith.constant 0 : index
    %5 = vector.load %arg5[%c72, %c0_4] : memref<73x256xf32, #tpu.memory_space<vmem>>, vector<1x256xf32>
    tpu.vector_store %arg5[%c72, %c0_4], %4 {strides = array<i32>} : memref<73x256xf32, #tpu.memory_space<vmem>>, vector<1x256xf32>,
    %6 = tpu.iota {dimensions = array<i32: 1>} : vector<8x256xi32>
    %c16_i32 = arith.constant 16 : i32
    %c0_i32 = arith.constant 0 : i32
    %7 = arith.cmpi eq, %c16_i32, %c0_i32 : i32
    %c1_i32 = arith.constant 1 : i32
    %8 = arith.select %7, %c1_i32, %c16_i32 : i32
    %9 = vector.broadcast %8 : i32 to vector<8x256xi32>
    %10 = arith.remsi %6, %9 : vector<8x256xi32>
    %c0_i32_5 = arith.constant 0 : i32
    %11 = vector.broadcast %c0_i32_5 : i32 to vector<8x256xi32>
    %12 = arith.cmpi ne, %10, %11 : vector<8x256xi32>
    %c0_i32_6 = arith.constant 0 : i32
    %13 = vector.broadcast %c0_i32_6 : i32 to vector<8x256xi32>
    %14 = arith.cmpi slt, %10, %13 : vector<8x256xi32>
    %c0_i32_7 = arith.constant 0 : i32
    %15 = arith.cmpi slt, %8, %c0_i32_7 : i32
    %16 = vector.broadcast %15 : i1 to vector<8x256xi1>
    %17 = vector.broadcast %16 : vector<8x256xi1> to vector<8x256xi1>
    %18 = arith.xori %14, %17 : vector<8x256xi1>
    %19 = arith.andi %18, %12 : vector<8x256xi1>
    %20 = vector.broadcast %8 : i32 to vector<8x256xi32>
    %21 = arith.addi %10, %20 : vector<8x256xi32>
    %22 = arith.select %19, %21, %10 : vector<8x256xi1>, vector<8x256xi32>
    %c0_i32_8 = arith.constant 0 : i32
    %23 = vector.broadcast %c0_i32_8 : i32 to vector<8x256xi32>
    %24 = arith.cmpi sgt, %22, %23 : vector<8x256xi32>
    %c15_i32 = arith.constant 15 : i32
    %25 = vector.broadcast %c15_i32 : i32 to vector<8x256xi32>
    %26 = arith.cmpi slt, %22, %25 : vector<8x256xi32>
    %c0_9 = arith.constant 0 : index
    %c0_10 = arith.constant 0 : index
    %c0_11 = arith.constant 0 : index
    %27 = vector.load %arg1[%c0_9, %c0_10, %c0_11] : memref<1x8x256xf32, #tpu.memory_space<vmem>>, vector<1x8x256xf32>
    %28 = vector.shape_cast %27 : vector<1x8x256xf32> to vector<8x256xf32>
    %c0_12 = arith.constant 0 : index
    %c0_13 = arith.constant 0 : index
    %c0_14 = arith.constant 0 : index
    %29 = vector.load %arg2[%c0_12, %c0_13, %c0_14] : memref<4x8x73xf32, #tpu.memory_space<vmem>>, vector<1x8x73xf32>
    %30 = vector.shape_cast %29 : vector<1x8x73xf32> to vector<8x73xf32>
    %c0_15 = arith.constant 0 : index
    %c128 = arith.constant 128 : index
    %31 = vector.load %arg4[%c0_15, %c128] : memref<8x512xf32, #tpu.memory_space<vmem>>, vector<8x256xf32>
    tpu.vector_store %arg4[%c0_15, %c128], %28 {strides = array<i32>} : memref<8x512xf32, #tpu.memory_space<vmem>>, vector<8x256xf32>,
    %c0_16 = arith.constant 0 : index
    %c111 = arith.constant 111 : index
    %32 = vector.load %arg4[%c0_16, %c111] : memref<8x512xf32, #tpu.memory_space<vmem>>, vector<8x256xf32>
    %cst_17 = arith.constant 0.000000e+00 : f32
    %33 = vector.broadcast %cst_17 : f32 to vector<8x256xf32>
    %34 = arith.select %24, %32, %33 : vector<8x256xi1>, vector<8x256xf32>
    %c0_18 = arith.constant 0 : index
    %c0_19 = arith.constant 0 : index
    %35 = vector.load %arg5[%c0_18, %c0_19] : memref<73x256xf32, #tpu.memory_space<vmem>>, vector<8x256xf32>
    tpu.vector_store %arg5[%c0_18, %c0_19], %34 {strides = array<i32>} : memref<73x256xf32, #tpu.memory_space<vmem>>, vector<8x256xf32>,
    %c0_20 = arith.constant 0 : index
    %c112 = arith.constant 112 : index
    %36 = vector.load %arg4[%c0_20, %c112] : memref<8x512xf32, #tpu.memory_space<vmem>>, vector<8x256xf32>
    %c8 = arith.constant 8 : index
    %c0_21 = arith.constant 0 : index
    %37 = vector.load %arg5[%c8, %c0_21] : memref<73x256xf32, #tpu.memory_space<vmem>>, vector<8x256xf32>
    tpu.vector_store %arg5[%c8, %c0_21], %36 {strides = array<i32>} : memref<73x256xf32, #tpu.memory_space<vmem>>, vector<8x256xf32>,
    %c0_22 = arith.constant 0 : index
    %c113 = arith.constant 113 : index
    %38 = vector.load %arg4[%c0_22, %c113] : memref<8x512xf32, #tpu.memory_space<vmem>>, vector<8x256xf32>
    %cst_23 = arith.constant 0.000000e+00 : f32
    %39 = vector.broadcast %cst_23 : f32 to vector<8x256xf32>
    %40 = arith.select %26, %38, %39 : vector<8x256xi1>, vector<8x256xf32>
    %c16 = arith.constant 16 : index
    %c0_24 = arith.constant 0 : index
    %41 = vector.load %arg5[%c16, %c0_24] : memref<73x256xf32, #tpu.memory_space<vmem>>, vector<8x256xf32>
    tpu.vector_store %arg5[%c16, %c0_24], %40 {strides = array<i32>} : memref<73x256xf32, #tpu.memory_space<vmem>>, vector<8x256xf32>,
    %c0_25 = arith.constant 0 : index
    %c127 = arith.constant 127 : index
    %42 = vector.load %arg4[%c0_25, %c127] : memref<8x512xf32, #tpu.memory_space<vmem>>, vector<8x256xf32>
    %cst_26 = arith.constant 0.000000e+00 : f32
    %43 = vector.broadcast %cst_26 : f32 to vector<8x256xf32>
    %44 = arith.select %24, %42, %43 : vector<8x256xi1>, vector<8x256xf32>
    %c24 = arith.constant 24 : index
    %c0_27 = arith.constant 0 : index
    %45 = vector.load %arg5[%c24, %c0_27] : memref<73x256xf32, #tpu.memory_space<vmem>>, vector<8x256xf32>
    tpu.vector_store %arg5[%c24, %c0_27], %44 {strides = array<i32>} : memref<73x256xf32, #tpu.memory_space<vmem>>, vector<8x256xf32>,
    %c0_28 = arith.constant 0 : index
    %c128_29 = arith.constant 128 : index
    %46 = vector.load %arg4[%c0_28, %c128_29] : memref<8x512xf32, #tpu.memory_space<vmem>>, vector<8x256xf32>
    %c32 = arith.constant 32 : index
    %c0_30 = arith.constant 0 : index
    %47 = vector.load %arg5[%c32, %c0_30] : memref<73x256xf32, #tpu.memory_space<vmem>>, vector<8x256xf32>
    tpu.vector_store %arg5[%c32, %c0_30], %46 {strides = array<i32>} : memref<73x256xf32, #tpu.memory_space<vmem>>, vector<8x256xf32>,
    %c0_31 = arith.constant 0 : index
    %c129 = arith.constant 129 : index
    %48 = vector.load %arg4[%c0_31, %c129] : memref<8x512xf32, #tpu.memory_space<vmem>>, vector<8x256xf32>
    %cst_32 = arith.constant 0.000000e+00 : f32
    %49 = vector.broadcast %cst_32 : f32 to vector<8x256xf32>
    %50 = arith.select %26, %48, %49 : vector<8x256xi1>, vector<8x256xf32>
    %c40 = arith.constant 40 : index
    %c0_33 = arith.constant 0 : index
    %51 = vector.load %arg5[%c40, %c0_33] : memref<73x256xf32, #tpu.memory_space<vmem>>, vector<8x256xf32>
    tpu.vector_store %arg5[%c40, %c0_33], %50 {strides = array<i32>} : memref<73x256xf32, #tpu.memory_space<vmem>>, vector<8x256xf32>,
    %c0_34 = arith.constant 0 : index
    %c143 = arith.constant 143 : index
    %52 = vector.load %arg4[%c0_34, %c143] : memref<8x512xf32, #tpu.memory_space<vmem>>, vector<8x256xf32>
    %cst_35 = arith.constant 0.000000e+00 : f32
    %53 = vector.broadcast %cst_35 : f32 to vector<8x256xf32>
    %54 = arith.select %24, %52, %53 : vector<8x256xi1>, vector<8x256xf32>
    %c48 = arith.constant 48 : index
    %c0_36 = arith.constant 0 : index
    %55 = vector.load %arg5[%c48, %c0_36] : memref<73x256xf32, #tpu.memory_space<vmem>>, vector<8x256xf32>
    tpu.vector_store %arg5[%c48, %c0_36], %54 {strides = array<i32>} : memref<73x256xf32, #tpu.memory_space<vmem>>, vector<8x256xf32>,
    %c0_37 = arith.constant 0 : index
    %c144 = arith.constant 144 : index
    %56 = vector.load %arg4[%c0_37, %c144] : memref<8x512xf32, #tpu.memory_space<vmem>>, vector<8x256xf32>
    %c56 = arith.constant 56 : index
    %c0_38 = arith.constant 0 : index
    %57 = vector.load %arg5[%c56, %c0_38] : memref<73x256xf32, #tpu.memory_space<vmem>>, vector<8x256xf32>
    tpu.vector_store %arg5[%c56, %c0_38], %56 {strides = array<i32>} : memref<73x256xf32, #tpu.memory_space<vmem>>, vector<8x256xf32>,
    %c0_39 = arith.constant 0 : index
    %c145 = arith.constant 145 : index
    %58 = vector.load %arg4[%c0_39, %c145] : memref<8x512xf32, #tpu.memory_space<vmem>>, vector<8x256xf32>
    %cst_40 = arith.constant 0.000000e+00 : f32
    %59 = vector.broadcast %cst_40 : f32 to vector<8x256xf32>
    %60 = arith.select %26, %58, %59 : vector<8x256xi1>, vector<8x256xf32>
    %c64 = arith.constant 64 : index
    %c0_41 = arith.constant 0 : index
    %61 = vector.load %arg5[%c64, %c0_41] : memref<73x256xf32, #tpu.memory_space<vmem>>, vector<8x256xf32>
    tpu.vector_store %arg5[%c64, %c0_41], %60 {strides = array<i32>} : memref<73x256xf32, #tpu.memory_space<vmem>>, vector<8x256xf32>,
    %c0_42 = arith.constant 0 : index
    %c0_43 = arith.constant 0 : index
    %62 = vector.load %arg5[%c0_42, %c0_43] : memref<73x256xf32, #tpu.memory_space<vmem>>, vector<73x256xf32>
    %cst_44 = arith.constant dense<0.000000e+00> : vector<8x256xf32>
    %63 = tpu.matmul %30, %62, %cst_44 {dimension_numbers = #tpu.dot_dimension_numbers<[1], [0], [0], [1], [0, 0, 1, 1], [], []>} : vector<8x73xf32>, vector<73x256xf32>, vector<8x256xf32> -> vector<8x256xf32>
    %cst_45 = arith.constant 0.000000e+00 : f32
    %64 = vector.broadcast %cst_45 : f32 to vector<8x256xf32>
    %65 = arith.maximumf %63, %64 : vector<8x256xf32>
    %c1 = arith.constant 1 : index
    %c0_46 = arith.constant 0 : index
    %c0_47 = arith.constant 0 : index
    %66 = vector.load %arg2[%c1, %c0_46, %c0_47] : memref<4x8x73xf32, #tpu.memory_space<vmem>>, vector<1x8x73xf32>
    %67 = vector.shape_cast %66 : vector<1x8x73xf32> to vector<8x73xf32>
    %c0_48 = arith.constant 0 : index
    %c128_49 = arith.constant 128 : index
    %68 = vector.load %arg4[%c0_48, %c128_49] : memref<8x512xf32, #tpu.memory_space<vmem>>, vector<8x256xf32>
    tpu.vector_store %arg4[%c0_48, %c128_49], %65 {strides = array<i32>} : memref<8x512xf32, #tpu.memory_space<vmem>>, vector<8x256xf32>,
    %c0_50 = arith.constant 0 : index
    %c111_51 = arith.constant 111 : index
    %69 = vector.load %arg4[%c0_50, %c111_51] : memref<8x512xf32, #tpu.memory_space<vmem>>, vector<8x256xf32>
    %cst_52 = arith.constant 0.000000e+00 : f32
    %70 = vector.broadcast %cst_52 : f32 to vector<8x256xf32>
    %71 = arith.select %24, %69, %70 : vector<8x256xi1>, vector<8x256xf32>
    %c0_53 = arith.constant 0 : index
    %c0_54 = arith.constant 0 : index
    %72 = vector.load %arg5[%c0_53, %c0_54] : memref<73x256xf32, #tpu.memory_space<vmem>>, vector<8x256xf32>
    tpu.vector_store %arg5[%c0_53, %c0_54], %71 {strides = array<i32>} : memref<73x256xf32, #tpu.memory_space<vmem>>, vector<8x256xf32>,
    %c0_55 = arith.constant 0 : index
    %c112_56 = arith.constant 112 : index
    %73 = vector.load %arg4[%c0_55, %c112_56] : memref<8x512xf32, #tpu.memory_space<vmem>>, vector<8x256xf32>
    %c8_57 = arith.constant 8 : index
    %c0_58 = arith.constant 0 : index
    %74 = vector.load %arg5[%c8_57, %c0_58] : memref<73x256xf32, #tpu.memory_space<vmem>>, vector<8x256xf32>
    tpu.vector_store %arg5[%c8_57, %c0_58], %73 {strides = array<i32>} : memref<73x256xf32, #tpu.memory_space<vmem>>, vector<8x256xf32>,
    %c0_59 = arith.constant 0 : index
    %c113_60 = arith.constant 113 : index
    %75 = vector.load %arg4[%c0_59, %c113_60] : memref<8x512xf32, #tpu.memory_space<vmem>>, vector<8x256xf32>
    %cst_61 = arith.constant 0.000000e+00 : f32
    %76 = vector.broadcast %cst_61 : f32 to vector<8x256xf32>
    %77 = arith.select %26, %75, %76 : vector<8x256xi1>, vector<8x256xf32>
    %c16_62 = arith.constant 16 : index
    %c0_63 = arith.constant 0 : index
    %78 = vector.load %arg5[%c16_62, %c0_63] : memref<73x256xf32, #tpu.memory_space<vmem>>, vector<8x256xf32>
    tpu.vector_store %arg5[%c16_62, %c0_63], %77 {strides = array<i32>} : memref<73x256xf32, #tpu.memory_space<vmem>>, vector<8x256xf32>,
    %c0_64 = arith.constant 0 : index
    %c127_65 = arith.constant 127 : index
    %79 = vector.load %arg4[%c0_64, %c127_65] : memref<8x512xf32, #tpu.memory_space<vmem>>, vector<8x256xf32>
    %cst_66 = arith.constant 0.000000e+00 : f32
    %80 = vector.broadcast %cst_66 : f32 to vector<8x256xf32>
    %81 = arith.select %24, %79, %80 : vector<8x256xi1>, vector<8x256xf32>
    %c24_67 = arith.constant 24 : index
    %c0_68 = arith.constant 0 : index
    %82 = vector.load %arg5[%c24_67, %c0_68] : memref<73x256xf32, #tpu.memory_space<vmem>>, vector<8x256xf32>
    tpu.vector_store %arg5[%c24_67, %c0_68], %81 {strides = array<i32>} : memref<73x256xf32, #tpu.memory_space<vmem>>, vector<8x256xf32>,
    %c0_69 = arith.constant 0 : index
    %c128_70 = arith.constant 128 : index
    %83 = vector.load %arg4[%c0_69, %c128_70] : memref<8x512xf32, #tpu.memory_space<vmem>>, vector<8x256xf32>
    %c32_71 = arith.constant 32 : index
    %c0_72 = arith.constant 0 : index
    %84 = vector.load %arg5[%c32_71, %c0_72] : memref<73x256xf32, #tpu.memory_space<vmem>>, vector<8x256xf32>
    tpu.vector_store %arg5[%c32_71, %c0_72], %83 {strides = array<i32>} : memref<73x256xf32, #tpu.memory_space<vmem>>, vector<8x256xf32>,
    %c0_73 = arith.constant 0 : index
    %c129_74 = arith.constant 129 : index
    %85 = vector.load %arg4[%c0_73, %c129_74] : memref<8x512xf32, #tpu.memory_space<vmem>>, vector<8x256xf32>
    %cst_75 = arith.constant 0.000000e+00 : f32
    %86 = vector.broadcast %cst_75 : f32 to vector<8x256xf32>
    %87 = arith.select %26, %85, %86 : vector<8x256xi1>, vector<8x256xf32>
    %c40_76 = arith.constant 40 : index
    %c0_77 = arith.constant 0 : index
    %88 = vector.load %arg5[%c40_76, %c0_77] : memref<73x256xf32, #tpu.memory_space<vmem>>, vector<8x256xf32>
    tpu.vector_store %arg5[%c40_76, %c0_77], %87 {strides = array<i32>} : memref<73x256xf32, #tpu.memory_space<vmem>>, vector<8x256xf32>,
    %c0_78 = arith.constant 0 : index
    %c143_79 = arith.constant 143 : index
    %89 = vector.load %arg4[%c0_78, %c143_79] : memref<8x512xf32, #tpu.memory_space<vmem>>, vector<8x256xf32>
    %cst_80 = arith.constant 0.000000e+00 : f32
    %90 = vector.broadcast %cst_80 : f32 to vector<8x256xf32>
    %91 = arith.select %24, %89, %90 : vector<8x256xi1>, vector<8x256xf32>
    %c48_81 = arith.constant 48 : index
    %c0_82 = arith.constant 0 : index
    %92 = vector.load %arg5[%c48_81, %c0_82] : memref<73x256xf32, #tpu.memory_space<vmem>>, vector<8x256xf32>
    tpu.vector_store %arg5[%c48_81, %c0_82], %91 {strides = array<i32>} : memref<73x256xf32, #tpu.memory_space<vmem>>, vector<8x256xf32>,
    %c0_83 = arith.constant 0 : index
    %c144_84 = arith.constant 144 : index
    %93 = vector.load %arg4[%c0_83, %c144_84] : memref<8x512xf32, #tpu.memory_space<vmem>>, vector<8x256xf32>
    %c56_85 = arith.constant 56 : index
    %c0_86 = arith.constant 0 : index
    %94 = vector.load %arg5[%c56_85, %c0_86] : memref<73x256xf32, #tpu.memory_space<vmem>>, vector<8x256xf32>
    tpu.vector_store %arg5[%c56_85, %c0_86], %93 {strides = array<i32>} : memref<73x256xf32, #tpu.memory_space<vmem>>, vector<8x256xf32>,
    %c0_87 = arith.constant 0 : index
    %c145_88 = arith.constant 145 : index
    %95 = vector.load %arg4[%c0_87, %c145_88] : memref<8x512xf32, #tpu.memory_space<vmem>>, vector<8x256xf32>
    %cst_89 = arith.constant 0.000000e+00 : f32
    %96 = vector.broadcast %cst_89 : f32 to vector<8x256xf32>
    %97 = arith.select %26, %95, %96 : vector<8x256xi1>, vector<8x256xf32>
    %c64_90 = arith.constant 64 : index
    %c0_91 = arith.constant 0 : index
    %98 = vector.load %arg5[%c64_90, %c0_91] : memref<73x256xf32, #tpu.memory_space<vmem>>, vector<8x256xf32>
    tpu.vector_store %arg5[%c64_90, %c0_91], %97 {strides = array<i32>} : memref<73x256xf32, #tpu.memory_space<vmem>>, vector<8x256xf32>,
    %c0_92 = arith.constant 0 : index
    %c0_93 = arith.constant 0 : index
    %99 = vector.load %arg5[%c0_92, %c0_93] : memref<73x256xf32, #tpu.memory_space<vmem>>, vector<73x256xf32>
    %cst_94 = arith.constant dense<0.000000e+00> : vector<8x256xf32>
    %100 = tpu.matmul %67, %99, %cst_94 {dimension_numbers = #tpu.dot_dimension_numbers<[1], [0], [0], [1], [0, 0, 1, 1], [], []>} : vector<8x73xf32>, vector<73x256xf32>, vector<8x256xf32> -> vector<8x256xf32>
    %101 = arith.addf %28, %100 : vector<8x256xf32>
    %c2 = arith.constant 2 : index
    %c0_95 = arith.constant 0 : index
    %c0_96 = arith.constant 0 : index
    %102 = vector.load %arg2[%c2, %c0_95, %c0_96] : memref<4x8x73xf32, #tpu.memory_space<vmem>>, vector<1x8x73xf32>
    %103 = vector.shape_cast %102 : vector<1x8x73xf32> to vector<8x73xf32>
    %c0_97 = arith.constant 0 : index
    %c128_98 = arith.constant 128 : index
    %104 = vector.load %arg4[%c0_97, %c128_98] : memref<8x512xf32, #tpu.memory_space<vmem>>, vector<8x256xf32>
    tpu.vector_store %arg4[%c0_97, %c128_98], %101 {strides = array<i32>} : memref<8x512xf32, #tpu.memory_space<vmem>>, vector<8x256xf32>,
    %c0_99 = arith.constant 0 : index
    %c111_100 = arith.constant 111 : index
    %105 = vector.load %arg4[%c0_99, %c111_100] : memref<8x512xf32, #tpu.memory_space<vmem>>, vector<8x256xf32>
    %cst_101 = arith.constant 0.000000e+00 : f32
    %106 = vector.broadcast %cst_101 : f32 to vector<8x256xf32>
    %107 = arith.select %24, %105, %106 : vector<8x256xi1>, vector<8x256xf32>
    %c0_102 = arith.constant 0 : index
    %c0_103 = arith.constant 0 : index
    %108 = vector.load %arg5[%c0_102, %c0_103] : memref<73x256xf32, #tpu.memory_space<vmem>>, vector<8x256xf32>
    tpu.vector_store %arg5[%c0_102, %c0_103], %107 {strides = array<i32>} : memref<73x256xf32, #tpu.memory_space<vmem>>, vector<8x256xf32>,
    %c0_104 = arith.constant 0 : index
    %c112_105 = arith.constant 112 : index
    %109 = vector.load %arg4[%c0_104, %c112_105] : memref<8x512xf32, #tpu.memory_space<vmem>>, vector<8x256xf32>
    %c8_106 = arith.constant 8 : index
    %c0_107 = arith.constant 0 : index
    %110 = vector.load %arg5[%c8_106, %c0_107] : memref<73x256xf32, #tpu.memory_space<vmem>>, vector<8x256xf32>
    tpu.vector_store %arg5[%c8_106, %c0_107], %109 {strides = array<i32>} : memref<73x256xf32, #tpu.memory_space<vmem>>, vector<8x256xf32>,
    %c0_108 = arith.constant 0 : index
    %c113_109 = arith.constant 113 : index
    %111 = vector.load %arg4[%c0_108, %c113_109] : memref<8x512xf32, #tpu.memory_space<vmem>>, vector<8x256xf32>
    %cst_110 = arith.constant 0.000000e+00 : f32
    %112 = vector.broadcast %cst_110 : f32 to vector<8x256xf32>
    %113 = arith.select %26, %111, %112 : vector<8x256xi1>, vector<8x256xf32>
    %c16_111 = arith.constant 16 : index
    %c0_112 = arith.constant 0 : index
    %114 = vector.load %arg5[%c16_111, %c0_112] : memref<73x256xf32, #tpu.memory_space<vmem>>, vector<8x256xf32>
    tpu.vector_store %arg5[%c16_111, %c0_112], %113 {strides = array<i32>} : memref<73x256xf32, #tpu.memory_space<vmem>>, vector<8x256xf32>,
    %c0_113 = arith.constant 0 : index
    %c127_114 = arith.constant 127 : index
    %115 = vector.load %arg4[%c0_113, %c127_114] : memref<8x512xf32, #tpu.memory_space<vmem>>, vector<8x256xf32>
    %cst_115 = arith.constant 0.000000e+00 : f32
    %116 = vector.broadcast %cst_115 : f32 to vector<8x256xf32>
    %117 = arith.select %24, %115, %116 : vector<8x256xi1>, vector<8x256xf32>
    %c24_116 = arith.constant 24 : index
    %c0_117 = arith.constant 0 : index
    %118 = vector.load %arg5[%c24_116, %c0_117] : memref<73x256xf32, #tpu.memory_space<vmem>>, vector<8x256xf32>
    tpu.vector_store %arg5[%c24_116, %c0_117], %117 {strides = array<i32>} : memref<73x256xf32, #tpu.memory_space<vmem>>, vector<8x256xf32>,
    %c0_118 = arith.constant 0 : index
    %c128_119 = arith.constant 128 : index
    %119 = vector.load %arg4[%c0_118, %c128_119] : memref<8x512xf32, #tpu.memory_space<vmem>>, vector<8x256xf32>
    %c32_120 = arith.constant 32 : index
    %c0_121 = arith.constant 0 : index
    %120 = vector.load %arg5[%c32_120, %c0_121] : memref<73x256xf32, #tpu.memory_space<vmem>>, vector<8x256xf32>
    tpu.vector_store %arg5[%c32_120, %c0_121], %119 {strides = array<i32>} : memref<73x256xf32, #tpu.memory_space<vmem>>, vector<8x256xf32>,
    %c0_122 = arith.constant 0 : index
    %c129_123 = arith.constant 129 : index
    %121 = vector.load %arg4[%c0_122, %c129_123] : memref<8x512xf32, #tpu.memory_space<vmem>>, vector<8x256xf32>
    %cst_124 = arith.constant 0.000000e+00 : f32
    %122 = vector.broadcast %cst_124 : f32 to vector<8x256xf32>
    %123 = arith.select %26, %121, %122 : vector<8x256xi1>, vector<8x256xf32>
    %c40_125 = arith.constant 40 : index
    %c0_126 = arith.constant 0 : index
    %124 = vector.load %arg5[%c40_125, %c0_126] : memref<73x256xf32, #tpu.memory_space<vmem>>, vector<8x256xf32>
    tpu.vector_store %arg5[%c40_125, %c0_126], %123 {strides = array<i32>} : memref<73x256xf32, #tpu.memory_space<vmem>>, vector<8x256xf32>,
    %c0_127 = arith.constant 0 : index
    %c143_128 = arith.constant 143 : index
    %125 = vector.load %arg4[%c0_127, %c143_128] : memref<8x512xf32, #tpu.memory_space<vmem>>, vector<8x256xf32>
    %cst_129 = arith.constant 0.000000e+00 : f32
    %126 = vector.broadcast %cst_129 : f32 to vector<8x256xf32>
    %127 = arith.select %24, %125, %126 : vector<8x256xi1>, vector<8x256xf32>
    %c48_130 = arith.constant 48 : index
    %c0_131 = arith.constant 0 : index
    %128 = vector.load %arg5[%c48_130, %c0_131] : memref<73x256xf32, #tpu.memory_space<vmem>>, vector<8x256xf32>
    tpu.vector_store %arg5[%c48_130, %c0_131], %127 {strides = array<i32>} : memref<73x256xf32, #tpu.memory_space<vmem>>, vector<8x256xf32>,
    %c0_132 = arith.constant 0 : index
    %c144_133 = arith.constant 144 : index
    %129 = vector.load %arg4[%c0_132, %c144_133] : memref<8x512xf32, #tpu.memory_space<vmem>>, vector<8x256xf32>
    %c56_134 = arith.constant 56 : index
    %c0_135 = arith.constant 0 : index
    %130 = vector.load %arg5[%c56_134, %c0_135] : memref<73x256xf32, #tpu.memory_space<vmem>>, vector<8x256xf32>
    tpu.vector_store %arg5[%c56_134, %c0_135], %129 {strides = array<i32>} : memref<73x256xf32, #tpu.memory_space<vmem>>, vector<8x256xf32>,
    %c0_136 = arith.constant 0 : index
    %c145_137 = arith.constant 145 : index
    %131 = vector.load %arg4[%c0_136, %c145_137] : memref<8x512xf32, #tpu.memory_space<vmem>>, vector<8x256xf32>
    %cst_138 = arith.constant 0.000000e+00 : f32
    %132 = vector.broadcast %cst_138 : f32 to vector<8x256xf32>
    %133 = arith.select %26, %131, %132 : vector<8x256xi1>, vector<8x256xf32>
    %c64_139 = arith.constant 64 : index
    %c0_140 = arith.constant 0 : index
    %134 = vector.load %arg5[%c64_139, %c0_140] : memref<73x256xf32, #tpu.memory_space<vmem>>, vector<8x256xf32>
    tpu.vector_store %arg5[%c64_139, %c0_140], %133 {strides = array<i32>} : memref<73x256xf32, #tpu.memory_space<vmem>>, vector<8x256xf32>,
    %c0_141 = arith.constant 0 : index
    %c0_142 = arith.constant 0 : index
    %135 = vector.load %arg5[%c0_141, %c0_142] : memref<73x256xf32, #tpu.memory_space<vmem>>, vector<73x256xf32>
    %cst_143 = arith.constant dense<0.000000e+00> : vector<8x256xf32>
    %136 = tpu.matmul %103, %135, %cst_143 {dimension_numbers = #tpu.dot_dimension_numbers<[1], [0], [0], [1], [0, 0, 1, 1], [], []>} : vector<8x73xf32>, vector<73x256xf32>, vector<8x256xf32> -> vector<8x256xf32>
    %cst_144 = arith.constant 0.000000e+00 : f32
    %137 = vector.broadcast %cst_144 : f32 to vector<8x256xf32>
    %138 = arith.maximumf %136, %137 : vector<8x256xf32>
    %c3 = arith.constant 3 : index
    %c0_145 = arith.constant 0 : index
    %c0_146 = arith.constant 0 : index
    %139 = vector.load %arg2[%c3, %c0_145, %c0_146] : memref<4x8x73xf32, #tpu.memory_space<vmem>>, vector<1x8x73xf32>
    %140 = vector.shape_cast %139 : vector<1x8x73xf32> to vector<8x73xf32>
    %c0_147 = arith.constant 0 : index
    %c128_148 = arith.constant 128 : index
    %141 = vector.load %arg4[%c0_147, %c128_148] : memref<8x512xf32, #tpu.memory_space<vmem>>, vector<8x256xf32>
    tpu.vector_store %arg4[%c0_147, %c128_148], %138 {strides = array<i32>} : memref<8x512xf32, #tpu.memory_space<vmem>>, vector<8x256xf32>,
    %c0_149 = arith.constant 0 : index
    %c111_150 = arith.constant 111 : index
    %142 = vector.load %arg4[%c0_149, %c111_150] : memref<8x512xf32, #tpu.memory_space<vmem>>, vector<8x256xf32>
    %cst_151 = arith.constant 0.000000e+00 : f32
    %143 = vector.broadcast %cst_151 : f32 to vector<8x256xf32>
    %144 = arith.select %24, %142, %143 : vector<8x256xi1>, vector<8x256xf32>
    %c0_152 = arith.constant 0 : index
    %c0_153 = arith.constant 0 : index
    %145 = vector.load %arg5[%c0_152, %c0_153] : memref<73x256xf32, #tpu.memory_space<vmem>>, vector<8x256xf32>
    tpu.vector_store %arg5[%c0_152, %c0_153], %144 {strides = array<i32>} : memref<73x256xf32, #tpu.memory_space<vmem>>, vector<8x256xf32>,
    %c0_154 = arith.constant 0 : index
    %c112_155 = arith.constant 112 : index
    %146 = vector.load %arg4[%c0_154, %c112_155] : memref<8x512xf32, #tpu.memory_space<vmem>>, vector<8x256xf32>
    %c8_156 = arith.constant 8 : index
    %c0_157 = arith.constant 0 : index
    %147 = vector.load %arg5[%c8_156, %c0_157] : memref<73x256xf32, #tpu.memory_space<vmem>>, vector<8x256xf32>
    tpu.vector_store %arg5[%c8_156, %c0_157], %146 {strides = array<i32>} : memref<73x256xf32, #tpu.memory_space<vmem>>, vector<8x256xf32>,
    %c0_158 = arith.constant 0 : index
    %c113_159 = arith.constant 113 : index
    %148 = vector.load %arg4[%c0_158, %c113_159] : memref<8x512xf32, #tpu.memory_space<vmem>>, vector<8x256xf32>
    %cst_160 = arith.constant 0.000000e+00 : f32
    %149 = vector.broadcast %cst_160 : f32 to vector<8x256xf32>
    %150 = arith.select %26, %148, %149 : vector<8x256xi1>, vector<8x256xf32>
    %c16_161 = arith.constant 16 : index
    %c0_162 = arith.constant 0 : index
    %151 = vector.load %arg5[%c16_161, %c0_162] : memref<73x256xf32, #tpu.memory_space<vmem>>, vector<8x256xf32>
    tpu.vector_store %arg5[%c16_161, %c0_162], %150 {strides = array<i32>} : memref<73x256xf32, #tpu.memory_space<vmem>>, vector<8x256xf32>,
    %c0_163 = arith.constant 0 : index
    %c127_164 = arith.constant 127 : index
    %152 = vector.load %arg4[%c0_163, %c127_164] : memref<8x512xf32, #tpu.memory_space<vmem>>, vector<8x256xf32>
    %cst_165 = arith.constant 0.000000e+00 : f32
    %153 = vector.broadcast %cst_165 : f32 to vector<8x256xf32>
    %154 = arith.select %24, %152, %153 : vector<8x256xi1>, vector<8x256xf32>
    %c24_166 = arith.constant 24 : index
    %c0_167 = arith.constant 0 : index
    %155 = vector.load %arg5[%c24_166, %c0_167] : memref<73x256xf32, #tpu.memory_space<vmem>>, vector<8x256xf32>
    tpu.vector_store %arg5[%c24_166, %c0_167], %154 {strides = array<i32>} : memref<73x256xf32, #tpu.memory_space<vmem>>, vector<8x256xf32>,
    %c0_168 = arith.constant 0 : index
    %c128_169 = arith.constant 128 : index
    %156 = vector.load %arg4[%c0_168, %c128_169] : memref<8x512xf32, #tpu.memory_space<vmem>>, vector<8x256xf32>
    %c32_170 = arith.constant 32 : index
    %c0_171 = arith.constant 0 : index
    %157 = vector.load %arg5[%c32_170, %c0_171] : memref<73x256xf32, #tpu.memory_space<vmem>>, vector<8x256xf32>
    tpu.vector_store %arg5[%c32_170, %c0_171], %156 {strides = array<i32>} : memref<73x256xf32, #tpu.memory_space<vmem>>, vector<8x256xf32>,
    %c0_172 = arith.constant 0 : index
    %c129_173 = arith.constant 129 : index
    %158 = vector.load %arg4[%c0_172, %c129_173] : memref<8x512xf32, #tpu.memory_space<vmem>>, vector<8x256xf32>
    %cst_174 = arith.constant 0.000000e+00 : f32
    %159 = vector.broadcast %cst_174 : f32 to vector<8x256xf32>
    %160 = arith.select %26, %158, %159 : vector<8x256xi1>, vector<8x256xf32>
    %c40_175 = arith.constant 40 : index
    %c0_176 = arith.constant 0 : index
    %161 = vector.load %arg5[%c40_175, %c0_176] : memref<73x256xf32, #tpu.memory_space<vmem>>, vector<8x256xf32>
    tpu.vector_store %arg5[%c40_175, %c0_176], %160 {strides = array<i32>} : memref<73x256xf32, #tpu.memory_space<vmem>>, vector<8x256xf32>,
    %c0_177 = arith.constant 0 : index
    %c143_178 = arith.constant 143 : index
    %162 = vector.load %arg4[%c0_177, %c143_178] : memref<8x512xf32, #tpu.memory_space<vmem>>, vector<8x256xf32>
    %cst_179 = arith.constant 0.000000e+00 : f32
    %163 = vector.broadcast %cst_179 : f32 to vector<8x256xf32>
    %164 = arith.select %24, %162, %163 : vector<8x256xi1>, vector<8x256xf32>
    %c48_180 = arith.constant 48 : index
    %c0_181 = arith.constant 0 : index
    %165 = vector.load %arg5[%c48_180, %c0_181] : memref<73x256xf32, #tpu.memory_space<vmem>>, vector<8x256xf32>
    tpu.vector_store %arg5[%c48_180, %c0_181], %164 {strides = array<i32>} : memref<73x256xf32, #tpu.memory_space<vmem>>, vector<8x256xf32>,
    %c0_182 = arith.constant 0 : index
    %c144_183 = arith.constant 144 : index
    %166 = vector.load %arg4[%c0_182, %c144_183] : memref<8x512xf32, #tpu.memory_space<vmem>>, vector<8x256xf32>
    %c56_184 = arith.constant 56 : index
    %c0_185 = arith.constant 0 : index
    %167 = vector.load %arg5[%c56_184, %c0_185] : memref<73x256xf32, #tpu.memory_space<vmem>>, vector<8x256xf32>
    tpu.vector_store %arg5[%c56_184, %c0_185], %166 {strides = array<i32>} : memref<73x256xf32, #tpu.memory_space<vmem>>, vector<8x256xf32>,
    %c0_186 = arith.constant 0 : index
    %c145_187 = arith.constant 145 : index
    %168 = vector.load %arg4[%c0_186, %c145_187] : memref<8x512xf32, #tpu.memory_space<vmem>>, vector<8x256xf32>
    %cst_188 = arith.constant 0.000000e+00 : f32
    %169 = vector.broadcast %cst_188 : f32 to vector<8x256xf32>
    %170 = arith.select %26, %168, %169 : vector<8x256xi1>, vector<8x256xf32>
    %c64_189 = arith.constant 64 : index
    %c0_190 = arith.constant 0 : index
    %171 = vector.load %arg5[%c64_189, %c0_190] : memref<73x256xf32, #tpu.memory_space<vmem>>, vector<8x256xf32>
    tpu.vector_store %arg5[%c64_189, %c0_190], %170 {strides = array<i32>} : memref<73x256xf32, #tpu.memory_space<vmem>>, vector<8x256xf32>,
    %c0_191 = arith.constant 0 : index
    %c0_192 = arith.constant 0 : index
    %172 = vector.load %arg5[%c0_191, %c0_192] : memref<73x256xf32, #tpu.memory_space<vmem>>, vector<73x256xf32>
    %cst_193 = arith.constant dense<0.000000e+00> : vector<8x256xf32>
    %173 = tpu.matmul %140, %172, %cst_193 {dimension_numbers = #tpu.dot_dimension_numbers<[1], [0], [0], [1], [0, 0, 1, 1], [], []>} : vector<8x73xf32>, vector<73x256xf32>, vector<8x256xf32> -> vector<8x256xf32>
    %174 = arith.addf %101, %173 : vector<8x256xf32>
    %c0_194 = arith.constant 0 : index
    %c0_195 = arith.constant 0 : index
    %c0_196 = arith.constant 0 : index
    %175 = vector.load %arg3[%c0_194, %c0_195, %c0_196] : memref<1x8x256xf32, #tpu.memory_space<vmem>>, vector<1x8x256xf32>
    %176 = vector.shape_cast %175 : vector<1x8x256xf32> to vector<8x256xf32>
    %177 = vector.shape_cast %174 : vector<8x256xf32> to vector<1x8x256xf32>
    tpu.vector_store %arg3[%c0_194, %c0_195, %c0_196], %177 {strides = array<i32>} : memref<1x8x256xf32, #tpu.memory_space<vmem>>, vector<1x8x256xf32>,
    return
  }
  func.func @transform_0(%arg0: i32) -> (i32, i32, i32) {
    %c0_i32 = arith.constant 0 : i32
    %c0_i32_0 = arith.constant 0 : i32
    %c0_i32_1 = arith.constant 0 : i32
    return %arg0, %c0_i32, %c0_i32_0 : i32, i32, i32
  }
  func.func @transform_1(%arg0: i32) -> (i32, i32, i32) {
    %c0_i32 = arith.constant 0 : i32
    %c0_i32_0 = arith.constant 0 : i32
    %c0_i32_1 = arith.constant 0 : i32
    %c0_i32_2 = arith.constant 0 : i32
    return %c0_i32, %c0_i32_0, %c0_i32_1 : i32, i32, i32
  }
  func.func @transform_2(%arg0: i32) -> (i32, i32, i32) {
    %c0_i32 = arith.constant 0 : i32
    %c0_i32_0 = arith.constant 0 : i32
    %c0_i32_1 = arith.constant 0 : i32
    return %arg0, %c0_i32, %c0_i32_0 : i32, i32, i32
  }
}

</mosaic_0001>

<bundles_post_ra>
// kernel: projnetx_forward.1
= control target key start
LH: loop header
LB: loop body
LE: loop exit
PB: predicated region body
PF: predicated region fallthrough
CT: control target
= control target key end

     0   :  { %s1443_s9 = smov 0   ;;  %s1869_s0 = inlined_call_operand.vmem [shape: f32[2,8,256], index: 0, kind: input, shape index: {}]   ;;  %s1870_s1 = inlined_call_operand.vmem [shape: f32[4,8,73], index: 1, kind: input, shape index: {}]   ;;  %s1871_s2 = inlined_call_operand.vmem [shape: f32[2,8,256], index: 2, kind: output, shape index: {}]  }
   0x1 LB: > { %s1316_s10 = sadd.s32 4294967295, %s1416_s9   ;;  %p1320_p0 = scmp.ge.s32.totalorder %s1416_s9, 1  ;;  %s1416_s9 = sphi %s1443_s9, %s12_s9  }
   0x2   : > { %p112_p1 = scmp.lt.s32.totalorder %s1416_s9, 3 }
   0x4   : > { %p113_p2 = pnand %p1320_p0, %p112_p1 }
   0x5   : > { %p134_p3 = scmp.lt.s32.totalorder (!%p113_p2), %s1316_s10, 1  ;;  %s1419_s11 = smov (!%p113_p2), 111  }
   0x6   : > { %116 = sbr.rel (%p113_p2) target bundleno = 1418 (0x58a), region = 28  ;;  %s1421_s16 = smov (!%p113_p2), 112  }
   0x7   : > { %s1422_s17 = smov (!%p113_p2), 113   ;;  %s1423_s18 = smov (!%p113_p2), 127  }
   0x8   : > { %s1424_s19 = smov (!%p113_p2), 1   ;;  %s1425_s20 = smov (!%p113_p2), 15  }
   0x9   : > { %s1426_s21 = smov (!%p113_p2), 16   ;;  %s1427_s22 = smov (!%p113_p2), 17  }
   0xb   : > { %v146_v0 = vlaneseq  ;;  %v1418_v1 = vmov 0.0   ;;  %s1881_s10 = smov (!%p134_p3, %s1316_s10), 1  ;;  %v1420_v2 = vmov 1.0   ;;  %vm381_vm1 = vcmask 1040384   ;;  %v186_v55 = vld [vmem:[%s1870_s1] sm:$0xff] }
   0xc   : > { %346 = vrot.lane.b32.xlu0 %v1418_v1, %s1419_s11  ;;  %452 = vmatprep.mubr.f32.mxu0 %v1418_v1  ;;  %s1342_s12 = sshll.u32 %s1881_s10, 4  ;;  %vm348_vm2 = vcmask 908288   ;;  %vm329_vm5 = vcmask 916480   ;;  %vm308_vm6 = vcmask 924672   ;;  %vm287_vm9 = vcmask 1039360  }
   0xd   : > { %vm148_vm0 = vcmp.lt.s32.totalorder %v146_v0, 256  ;;  %718 = vmatprep.mubr.f32.mxu1 %v1418_v1  ;;  %s138_s15 = scalar_lea.vmem %s1869_s0, %s1342_s12  ;;  %v154_v7 = vand.u32 127, %v146_v0  ;;  %vm262_vm10 = vcmask 7168   ;;  %vm241_vm11 = vcmask 121856   ;;  %s143_s5 = scalar_lea.vmem %s1871_s2, %s1342_s12 }
   0xe   : > { %151 = vst.msk [vmem:[#allocation3 + $0x90] ss:$8 sm:$0x3] %vm148_vm0, %v1420_v2  ;;  %v1463_v3 = vld [vmem:[%s138_s15 + $0x8] sm:$0xff]  ;;  %v1465_v4 = vld [vmem:[%s138_s15] sm:$0xff]  ;;  %vm222_vm12 = vcmask 130048  }
   0xf   : > { %342 = vrot.lane.b32.xlu1 %v1465_v4, %s1419_s11  ;;  %v155_v8 = vadd.s32 128, %v154_v7  ;;  %v160_v11 = vand.u32 15, %v154_v7  ;;  %vm201_vm13 = vcmask 138240   ;;  %vm377_vm14 = vcmask 596992  }
  0x10   : > { %344 = vrot.lane.b32.xlu0 %v1463_v3, %s1419_s11 }
  0x11   : > { %v167_v10 = vand.u32 15, %v155_v8  ;;  %vm1531_vm4 = vcmp.lt.s32.totalorder %v160_v11, 15  ;;  %vm1547_vm8 = vcmp.gt.s32.totalorder %v160_v11, 0 }
  0x13   : > { %325 = vrot.lane.b32.xlu1 %v1463_v3, %s1421_s16  ;;  %vm1527_vm3 = vcmp.lt.s32.totalorder %v167_v10, 15  ;;  %vm1542_vm7 = vcmp.gt.s32.totalorder %v167_v10, 0 }
  0x14   : > { %327 = vrot.lane.b32.xlu0 %v1418_v1, %s1421_s16 }
  0x15   : > { %v376_v5 = vld [vmem:[#allocation3 + $0x98] sm:$0x1]  ;;  %v375_v6 = vld [vmem:[#allocation3 + $0x90] sm:$0x1] }
  0x16   : > { %1325 = vmatprep.subr.msk.mxu0 %vm381_vm1, %v376_v5  ;;  %v644_v58 = vld [vmem:[#allocation3 + $0x98] sm:$0x1]  ;;  %v643_v59 = vld [vmem:[#allocation3 + $0x90] sm:$0x1] }
  0x17   : > { %1326 = vmatpush1.msk.msra.mxu0 %vm381_vm1, %v375_v6  ;;  %304 = vrot.lane.b32.xlu1 %v1463_v3, %s1422_s17 }
  0x18   : > { %306 = vrot.lane.b32.xlu0 %v1418_v1, %s1422_s17  ;;  %1329 = vmatprep.subr.msk.mxu1 %vm381_vm1, %v644_v58 }
  0x19   : > { %1330 = vmatpush1.msk.msra.mxu1 %vm381_vm1, %v643_v59 }
  0x1b   : > { %323 = vrot.lane.b32.xlu1 %v1465_v4, %s1421_s16 }
  0x1c   : > { %302 = vrot.lane.b32.xlu0 %v1465_v4, %s1422_s17 }
  0x1f   : > { %283 = vrot.lane.b32.xlu1 %v1463_v3, %s1423_s18 }
  0x20   : > { %285 = vrot.lane.b32.xlu0 %v1418_v1, %s1423_s18 }
  0x23   : > { %281 = vrot.lane.b32.xlu1 %v1465_v4, %s1423_s18 }
  0x24   : > { %258 = vrot.lane.b32.xlu0 %v1465_v4, %s1424_s19 }
  0x27   : > { %260 = vrot.lane.b32.xlu1 %v1463_v3, %s1424_s19 }
  0x28   : > { %256 = vrot.lane.b32.xlu0 %v1418_v1, %s1424_s19 }
  0x2b   : > { %237 = vrot.lane.b32.xlu1 %v1465_v4, %s1425_s20 }
  0x2c   : > { %239 = vrot.lane.b32.xlu0 %v1463_v3, %s1425_s20 }
  0x2f   : > { %235 = vrot.lane.b32.xlu1 %v1418_v1, %s1425_s20 }
  0x30   : > { %218 = vrot.lane.b32.xlu0 %v1465_v4, %s1426_s21 }
  0x33   : > { %220 = vrot.lane.b32.xlu1 %v1463_v3, %s1426_s21 }
  0x34   : > { %197 = vrot.lane.b32.xlu0 %v1465_v4, %s1427_s22 }
  0x37   : > { %199 = vrot.lane.b32.xlu1 %v1463_v3, %s1427_s22 }
  0x38   : > { %216 = vrot.lane.b32.xlu0 %v1418_v1, %s1426_s21 }
  0x3b   : > { %195 = vrot.lane.b32.xlu1 %v1418_v1, %s1427_s22 }
  0x3c   : > { %597 = vrot.lane.b32.xlu0 %v1418_v1, %s1421_s16 }
  0x3f   : > { %615 = vrot.lane.b32.xlu1 %v1418_v1, %s1419_s11 }
  0x40   : > { %577 = vrot.lane.b32.xlu0 %v1418_v1, %s1422_s17 }
  0x43   : > { %509 = vrot.lane.b32.xlu1 %v1418_v1, %s1425_s20 }
  0x44   : > { %557 = vrot.lane.b32.xlu0 %v1418_v1, %s1423_s18 }
  0x48   : > { %529 = vrot.lane.b32.xlu0 %v1418_v1, %s1424_s19 }
  0x7e   : > { %v347_v9 = vpop.permute.xlu0 %346 }
  0x81   : > { %v343_v15 = vpop.permute.xlu1 %342 }
  0x82   : > { %v345_v14 = vpop.permute.xlu0 %344 }
  0x83   : > { %v350_v16 = vsel %vm348_vm2, %v345_v14, %v347_v9  ;;  %v349_v17 = vsel %vm348_vm2, %v343_v15, %v345_v14 }
  0x84   : > { %1362 = vmatprep.subr.msk.mxu0 %vm1527_vm3, %v350_v16 }
  0x85   : > { %v326_v19 = vpop.permute.xlu1 %325  ;;  %1363 = vmatpush1.msk.msra.mxu0 %vm1531_vm4, %v349_v17 }
  0x86   : > { %v328_v18 = vpop.permute.xlu0 %327 }
  0x87   : > { %v331_v20 = vsel %vm329_vm5, %v326_v19, %v328_v18 }
  0x88   : > { %404 = vmatprep.subr.mxu0 %v331_v20 }
  0x89   : > { %v305_v22 = vpop.permute.xlu1 %304 }
  0x8a   : > { %v307_v21 = vpop.permute.xlu0 %306 }
  0x8b   : > { %v310_v24 = vsel %vm308_vm6, %v305_v22, %v307_v21 }
  0x8d   : > { %v324_v27 = vpop.permute.xlu1 %323 }
  0x8e   : > { %v303_v26 = vpop.permute.xlu0 %302  ;;  %v330_v29 = vsel %vm329_vm5, %v324_v27, %v326_v19 }
  0x8f   : > { %v309_v28 = vsel %vm308_vm6, %v303_v26, %v305_v22  ;;  %405 = vmatpush1.msra.mxu0 %v330_v29 }
  0x90   : > { %1364 = vmatprep.subr.msk.mxu0 %vm1542_vm7, %v310_v24 }
  0x91   : > { %v284_v31 = vpop.permute.xlu1 %283  ;;  %1365 = vmatpush1.msk.msra.mxu0 %vm1547_vm8, %v309_v28 }
  0x92   : > { %v286_v30 = vpop.permute.xlu0 %285 }
  0x93   : > { %v289_v32 = vsel %vm287_vm9, %v284_v31, %v286_v30 }
  0x94   : > { %1366 = vmatprep.subr.msk.mxu0 %vm1527_vm3, %v289_v32 }
  0x95   : > { %v282_v34 = vpop.permute.xlu1 %281 }
  0x96   : > { %v259_v33 = vpop.permute.xlu0 %258  ;;  %v288_v35 = vsel %vm287_vm9, %v282_v34, %v284_v31 }
  0x97   : > { %1367 = vmatpush1.msk.msra.mxu0 %vm1531_vm4, %v288_v35 }
  0x98   : > { %410 = vmatprep.subr.mxu0 %v1463_v3 }
  0x99   : > { %v261_v37 = vpop.permute.xlu1 %260  ;;  %411 = vmatpush1.msra.mxu0 %v1465_v4 }
  0x9a   : > { %v257_v36 = vpop.permute.xlu0 %256  ;;  %v264_v39 = vsel %vm262_vm10, %v259_v33, %v261_v37 }
  0x9b   : > { %v263_v38 = vsel %vm262_vm10, %v257_v36, %v259_v33  ;;  %1368 = vmatprep.subr.msk.mxu0 %vm1542_vm7, %v264_v39 }
  0x9c   : > { %1369 = vmatpush1.msk.msra.mxu0 %vm1547_vm8, %v263_v38 }
  0x9d   : > { %v238_v41 = vpop.permute.xlu1 %237 }
  0x9e   : > { %v240_v40 = vpop.permute.xlu0 %239 }
  0x9f   : > { %v243_v42 = vsel %vm241_vm11, %v238_v41, %v240_v40 }
  0xa0   : > { %1370 = vmatprep.subr.msk.mxu0 %vm1527_vm3, %v243_v42 }
  0xa1   : > { %v236_v44 = vpop.permute.xlu1 %235 }
  0xa2   : > { %v219_v43 = vpop.permute.xlu0 %218  ;;  %v242_v45 = vsel %vm241_vm11, %v236_v44, %v238_v41 }
  0xa3   : > { %1371 = vmatpush1.msk.msra.mxu0 %vm1531_vm4, %v242_v45  ;;  %v1328_v45 = vld [vmem:[%s1870_s1 + $0x8] sm:$0xff] }
  0xa5   : > { %v221_v47 = vpop.permute.xlu1 %220 }
  0xa6   : > { %v198_v46 = vpop.permute.xlu0 %197  ;;  %v224_v48 = vsel %vm222_vm12, %v219_v43, %v221_v47 }
  0xa7   : > { %416 = vmatprep.subr.mxu0 %v224_v48  ;;  %v910_v48 = vld [vmem:[#allocation3 + $0x98] sm:$0x1] }
  0xa9   : > { %v200_v50 = vpop.permute.xlu1 %199 }
  0xaa   : > { %v217_v49 = vpop.permute.xlu0 %216  ;;  %v203_v52 = vsel %vm201_vm13, %v198_v46, %v200_v50 }
  0xab   : > { %v223_v51 = vsel %vm222_vm12, %v217_v49, %v219_v43  ;;  %v909_v49 = vld [vmem:[#allocation3 + $0x90] sm:$0x1] }
  0xac   : > { %417 = vmatpush1.msra.mxu0 %v223_v51 }
  0xad   : > { %1372 = vmatprep.subr.msk.mxu0 %vm1542_vm7, %v203_v52  ;;  %v196_v53 = vpop.permute.xlu1 %195 }
  0xae   : > { %v202_v54 = vsel %vm201_vm13, %v196_v53, %v198_v46  ;;  %v598_v62 = vpop.permute.xlu0 %597 }
  0xaf   : > { %1373 = vmatpush1.msk.msra.mxu0 %vm1547_vm8, %v202_v54 }
  0xb0   : > { %1327 = vmatmul.mubr.msk.f32.vlgmr.msra.gmra.mxu0 %vm377_vm14, %v186_v55  ;;  %1333 = vmatprep.subr.msk.mxu0 %vm381_vm1, %v910_v48 }
  0xb1   : > { %984 = vmatprep.mubr.f32.mxu0 %v1418_v1  ;;  %v616_v2 = vpop.permute.xlu1 %615  ;;  %1334 = vmatpush1.msk.msra.mxu0 %vm381_vm1, %v909_v49 }
  0xb2   : > { %v578_v63 = vpop.permute.xlu0 %577 }
  0xb5   : > { %v510_v6 = vpop.permute.xlu1 %509 }
  0xb6   : > { %v558_v0 = vpop.permute.xlu0 %557 }
  0xba   : > { %v530_v5 = vpop.permute.xlu0 %529 }
 0x170   : > { %v454_v56 = vpop.f32.mrf.mxu0 }
 0x171   : > { %v1590_v57 = vmax.f32 %v454_v56, 0.0 }
 0x172   : > { %v456_v60 = vpop.f32.mrf.mxu0 }
 0x173   : > { %593 = vrot.lane.b32.xlu1 %v1590_v57, %s1421_s16  ;;  %611 = vrot.lane.b32.xlu0 %v1590_v57, %s1419_s11  ;;  %v460_v61 = vmax.f32 %v456_v60, 0.0 }
 0x177   : > { %553 = vrot.lane.b32.xlu1 %v1590_v57, %s1423_s18  ;;  %573 = vrot.lane.b32.xlu0 %v1590_v57, %s1422_s17 }
 0x17b   : > { %511 = vrot.lane.b32.xlu1 %v1590_v57, %s1425_s20  ;;  %531 = vrot.lane.b32.xlu0 %v1590_v57, %s1424_s19 }
 0x17f   : > { %595 = vrot.lane.b32.xlu1 %v460_v61, %s1421_s16  ;;  %613 = vrot.lane.b32.xlu0 %v460_v61, %s1419_s11 }
 0x183   : > { %575 = vrot.lane.b32.xlu1 %v460_v61, %s1422_s17  ;;  %493 = vrot.lane.b32.xlu0 %v1590_v57, %s1426_s21 }
 0x187   : > { %555 = vrot.lane.b32.xlu1 %v460_v61, %s1423_s18  ;;  %473 = vrot.lane.b32.xlu0 %v1590_v57, %s1427_s22 }
 0x18b   : > { %533 = vrot.lane.b32.xlu1 %v460_v61, %s1424_s19  ;;  %513 = vrot.lane.b32.xlu0 %v460_v61, %s1425_s20 }
 0x18f   : > { %495 = vrot.lane.b32.xlu1 %v460_v61, %s1426_s21  ;;  %491 = vrot.lane.b32.xlu0 %v1418_v1, %s1426_s21 }
 0x193   : > { %475 = vrot.lane.b32.xlu1 %v460_v61, %s1427_s22  ;;  %863 = vrot.lane.b32.xlu0 %v1418_v1, %s1421_s16 }
 0x197   : > { %471 = vrot.lane.b32.xlu1 %v1418_v1, %s1427_s22  ;;  %843 = vrot.lane.b32.xlu0 %v1418_v1, %s1422_s17 }
 0x19b   : > { %881 = vrot.lane.b32.xlu1 %v1418_v1, %s1419_s11  ;;  %823 = vrot.lane.b32.xlu0 %v1418_v1, %s1423_s18 }
 0x19f   : > { %775 = vrot.lane.b32.xlu1 %v1418_v1, %s1425_s20  ;;  %795 = vrot.lane.b32.xlu0 %v1418_v1, %s1424_s19 }
 0x1e5   : > { %v594_v7 = vpop.permute.xlu1 %593  ;;  %v612_v8 = vpop.permute.xlu0 %611 }
 0x1e9   : > { %v554_v9 = vpop.permute.xlu1 %553  ;;  %v574_v10 = vpop.permute.xlu0 %573 }
 0x1ed   : > { %v512_v11 = vpop.permute.xlu1 %511  ;;  %v532_v14 = vpop.permute.xlu0 %531 }
 0x1ee   : > { %v535_v31 = vsel %vm262_vm10, %v530_v5, %v532_v14  ;;  %v515_v36 = vsel %vm241_vm11, %v510_v6, %v512_v11 }
 0x1f1   : > { %v596_v15 = vpop.permute.xlu1 %595  ;;  %v614_v16 = vpop.permute.xlu0 %613 }
 0x1f2   : > { %v617_v17 = vsel %vm348_vm2, %v612_v8, %v614_v16  ;;  %v618_v18 = vsel %vm348_vm2, %v614_v16, %v616_v2  ;;  %v600_v19 = vsel %vm329_vm5, %v596_v15, %v598_v62  ;;  %v599_v22 = vsel %vm329_vm5, %v594_v7, %v596_v15 }
 0x1f3   : > { %1374 = vmatprep.subr.msk.mxu1 %vm1527_vm3, %v618_v18 }
 0x1f4   : > { %1375 = vmatpush1.msk.msra.mxu1 %vm1531_vm4, %v617_v17 }
 0x1f5   : > { %v576_v20 = vpop.permute.xlu1 %575  ;;  %v494_v21 = vpop.permute.xlu0 %493  ;;  %670 = vmatprep.subr.mxu1 %v600_v19 }
 0x1f6   : > { %v579_v24 = vsel %vm308_vm6, %v574_v10, %v576_v20  ;;  %v580_v26 = vsel %vm308_vm6, %v576_v20, %v578_v63  ;;  %671 = vmatpush1.msra.mxu1 %v599_v22 }
 0x1f7   : > { %1376 = vmatprep.subr.msk.mxu1 %vm1542_vm7, %v580_v26 }
 0x1f8   : > { %1377 = vmatpush1.msk.msra.mxu1 %vm1547_vm8, %v579_v24 }
 0x1f9   : > { %v556_v27 = vpop.permute.xlu1 %555  ;;  %v474_v28 = vpop.permute.xlu0 %473 }
 0x1fa   : > { %v559_v29 = vsel %vm287_vm9, %v554_v9, %v556_v27  ;;  %v560_v30 = vsel %vm287_vm9, %v556_v27, %v558_v0 }
 0x1fb   : > { %1378 = vmatprep.subr.msk.mxu1 %vm1527_vm3, %v560_v30 }
 0x1fc   : > { %1379 = vmatpush1.msk.msra.mxu1 %vm1531_vm4, %v559_v29 }
 0x1fd   : > { %v534_v32 = vpop.permute.xlu1 %533  ;;  %v514_v33 = vpop.permute.xlu0 %513  ;;  %676 = vmatprep.subr.mxu1 %v460_v61 }
 0x1fe   : > { %v536_v34 = vsel %vm262_vm10, %v532_v14, %v534_v32  ;;  %v516_v35 = vsel %vm241_vm11, %v512_v11, %v514_v33  ;;  %677 = vmatpush1.msra.mxu1 %v1590_v57  ;;  %v1332_v33 = vld [vmem:[%s1870_s1 + $0x10] sm:$0xff] }
 0x1ff   : > { %1380 = vmatprep.subr.msk.mxu1 %vm1542_vm7, %v536_v34 }
 0x200   : > { %1381 = vmatpush1.msk.msra.mxu1 %vm1547_vm8, %v535_v31 }
 0x201   : > { %v496_v37 = vpop.permute.xlu1 %495  ;;  %v492_v38 = vpop.permute.xlu0 %491  ;;  %1382 = vmatprep.subr.msk.mxu1 %vm1527_vm3, %v516_v35 }
 0x202   : > { %v498_v39 = vsel %vm222_vm12, %v494_v21, %v496_v37  ;;  %1383 = vmatpush1.msk.msra.mxu1 %vm1531_vm4, %v515_v36  ;;  %v497_v40 = vsel %vm222_vm12, %v492_v38, %v494_v21  ;;  %v1176_v36 = vld [vmem:[#allocation3 + $0x98] sm:$0x1]  ;;  %v1175_v38 = vld [vmem:[#allocation3 + $0x90] sm:$0x1] }
 0x203   : > { %682 = vmatprep.subr.mxu1 %v498_v39 }
 0x204   : > { %683 = vmatpush1.msra.mxu1 %v497_v40 }
 0x205   : > { %v476_v41 = vpop.permute.xlu1 %475 }
 0x206   : > { %v478_v42 = vsel %vm201_vm13, %v474_v28, %v476_v41 }
 0x207   : > { %1384 = vmatprep.subr.msk.mxu1 %vm1542_vm7, %v478_v42 }
 0x209   : > { %v472_v43 = vpop.permute.xlu1 %471 }
 0x20a   : > { %v477_v44 = vsel %vm201_vm13, %v472_v43, %v474_v28 }
 0x20b   : > { %1385 = vmatpush1.msk.msra.mxu1 %vm1547_vm8, %v477_v44 }
 0x20c   : > { %1331 = vmatmul.mubr.msk.f32.vlgmr.msra.gmra.mxu1 %vm377_vm14, %v1328_v45  ;;  %1337 = vmatprep.subr.msk.mxu1 %vm381_vm1, %v1176_v36 }
 0x20d   : > { %1250 = vmatprep.mubr.f32.mxu1 %v1418_v1  ;;  %v882_v52 = vpop.permute.xlu1 %881  ;;  %1338 = vmatpush1.msk.msra.mxu1 %vm381_vm1, %v1175_v38 }
 0x211   : > { %v776_v54 = vpop.permute.xlu1 %775 }
 0x2cc   : > { %v720_v46 = vpop.f32.mrf.mxu1 }
 0x2cd   : > { %v1681_v47 = vadd.f32 %v720_v46, %v1465_v4 }
 0x2ce   : > { %v722_v4 = vpop.f32.mrf.mxu1 }
 0x2cf   : > { %859 = vrot.lane.b32.xlu1 %v1681_v47, %s1421_s16  ;;  %877 = vrot.lane.b32.xlu0 %v1681_v47, %s1419_s11  ;;  %v1698_v50 = vadd.f32 %v722_v4, %v1463_v3  ;;  %v864_v3 = vpop.permute.xlu0 %863 }
 0x2d3   : > { %819 = vrot.lane.b32.xlu1 %v1681_v47, %s1423_s18  ;;  %839 = vrot.lane.b32.xlu0 %v1681_v47, %s1422_s17  ;;  %v844_v51 = vpop.permute.xlu0 %843 }
 0x2d7   : > { %777 = vrot.lane.b32.xlu1 %v1681_v47, %s1425_s20  ;;  %797 = vrot.lane.b32.xlu0 %v1681_v47, %s1424_s19  ;;  %v824_v53 = vpop.permute.xlu0 %823 }
 0x2db   : > { %861 = vrot.lane.b32.xlu1 %v1698_v50, %s1421_s16  ;;  %879 = vrot.lane.b32.xlu0 %v1698_v50, %s1419_s11  ;;  %v796_v55 = vpop.permute.xlu0 %795 }
 0x2df   : > { %841 = vrot.lane.b32.xlu1 %v1698_v50, %s1422_s17  ;;  %759 = vrot.lane.b32.xlu0 %v1681_v47, %s1426_s21 }
 0x2e3   : > { %821 = vrot.lane.b32.xlu1 %v1698_v50, %s1423_s18  ;;  %739 = vrot.lane.b32.xlu0 %v1681_v47, %s1427_s22 }
 0x2e7   : > { %799 = vrot.lane.b32.xlu1 %v1698_v50, %s1424_s19  ;;  %779 = vrot.lane.b32.xlu0 %v1698_v50, %s1425_s20 }
 0x2eb   : > { %761 = vrot.lane.b32.xlu1 %v1698_v50, %s1426_s21  ;;  %757 = vrot.lane.b32.xlu0 %v1418_v1, %s1426_s21 }
 0x2ef   : > { %741 = vrot.lane.b32.xlu1 %v1698_v50, %s1427_s22  ;;  %1129 = vrot.lane.b32.xlu0 %v1418_v1, %s1421_s16 }
 0x2f3   : > { %737 = vrot.lane.b32.xlu1 %v1418_v1, %s1427_s22  ;;  %1109 = vrot.lane.b32.xlu0 %v1418_v1, %s1422_s17 }
 0x2f7   : > { %1147 = vrot.lane.b32.xlu1 %v1418_v1, %s1419_s11  ;;  %1089 = vrot.lane.b32.xlu0 %v1418_v1, %s1423_s18 }
 0x2fb   : > { %1041 = vrot.lane.b32.xlu1 %v1418_v1, %s1425_s20  ;;  %1061 = vrot.lane.b32.xlu0 %v1418_v1, %s1424_s19 }
 0x341   : > { %v860_v56 = vpop.permute.xlu1 %859  ;;  %v878_v57 = vpop.permute.xlu0 %877 }
 0x345   : > { %v820_v58 = vpop.permute.xlu1 %819  ;;  %v840_v59 = vpop.permute.xlu0 %839 }
 0x349   : > { %v778_v60 = vpop.permute.xlu1 %777  ;;  %v798_v61 = vpop.permute.xlu0 %797 }
 0x34a   : > { %v801_v17 = vsel %vm262_vm10, %v796_v55, %v798_v61  ;;  %v781_v22 = vsel %vm241_vm11, %v776_v54, %v778_v60 }
 0x34d   : > { %v862_v62 = vpop.permute.xlu1 %861  ;;  %v880_v63 = vpop.permute.xlu0 %879 }
 0x34e   : > { %v883_v0 = vsel %vm348_vm2, %v878_v57, %v880_v63  ;;  %v884_v2 = vsel %vm348_vm2, %v880_v63, %v882_v52  ;;  %v866_v5 = vsel %vm329_vm5, %v862_v62, %v864_v3  ;;  %v865_v8 = vsel %vm329_vm5, %v860_v56, %v862_v62 }
 0x34f   : > { %1386 = vmatprep.subr.msk.mxu0 %vm1527_vm3, %v884_v2 }
 0x350   : > { %1387 = vmatpush1.msk.msra.mxu0 %vm1531_vm4, %v883_v0 }
 0x351   : > { %v842_v6 = vpop.permute.xlu1 %841  ;;  %v760_v7 = vpop.permute.xlu0 %759  ;;  %936 = vmatprep.subr.mxu0 %v866_v5 }
 0x352   : > { %v845_v9 = vsel %vm308_vm6, %v840_v59, %v842_v6  ;;  %v846_v10 = vsel %vm308_vm6, %v842_v6, %v844_v51  ;;  %937 = vmatpush1.msra.mxu0 %v865_v8 }
 0x353   : > { %1388 = vmatprep.subr.msk.mxu0 %vm1542_vm7, %v846_v10 }
 0x354   : > { %1389 = vmatpush1.msk.msra.mxu0 %vm1547_vm8, %v845_v9 }
 0x355   : > { %v822_v11 = vpop.permute.xlu1 %821  ;;  %v740_v14 = vpop.permute.xlu0 %739 }
 0x356   : > { %v825_v15 = vsel %vm287_vm9, %v820_v58, %v822_v11  ;;  %v826_v16 = vsel %vm287_vm9, %v822_v11, %v824_v53 }
 0x357   : > { %1390 = vmatprep.subr.msk.mxu0 %vm1527_vm3, %v826_v16 }
 0x358   : > { %1391 = vmatpush1.msk.msra.mxu0 %vm1531_vm4, %v825_v15 }
 0x359   : > { %v800_v18 = vpop.permute.xlu1 %799  ;;  %v780_v19 = vpop.permute.xlu0 %779  ;;  %942 = vmatprep.subr.mxu0 %v1698_v50 }
 0x35a   : > { %v802_v20 = vsel %vm262_vm10, %v798_v61, %v800_v18  ;;  %v782_v21 = vsel %vm241_vm11, %v778_v60, %v780_v19  ;;  %943 = vmatpush1.msra.mxu0 %v1681_v47 }
 0x35b   : > { %1392 = vmatprep.subr.msk.mxu0 %vm1542_vm7, %v802_v20  ;;  %v1336_v20 = vld [vmem:[%s1870_s1 + $0x18] sm:$0xff] }
 0x35c   : > { %1393 = vmatpush1.msk.msra.mxu0 %vm1547_vm8, %v801_v17 }
 0x35d   : > { %v762_v24 = vpop.permute.xlu1 %761  ;;  %v758_v26 = vpop.permute.xlu0 %757  ;;  %1394 = vmatprep.subr.msk.mxu0 %vm1527_vm3, %v782_v21 }
 0x35e   : > { %v764_v27 = vsel %vm222_vm12, %v760_v7, %v762_v24  ;;  %1395 = vmatpush1.msk.msra.mxu0 %vm1531_vm4, %v781_v22  ;;  %v763_v28 = vsel %vm222_vm12, %v758_v26, %v760_v7 }
 0x35f   : > { %948 = vmatprep.subr.mxu0 %v764_v27 }
 0x360   : > { %949 = vmatpush1.msra.mxu0 %v763_v28 }
 0x361   : > { %v742_v29 = vpop.permute.xlu1 %741  ;;  %v1130_v40 = vpop.permute.xlu0 %1129 }
 0x362   : > { %v744_v30 = vsel %vm201_vm13, %v740_v14, %v742_v29 }
 0x363   : > { %1396 = vmatprep.subr.msk.mxu0 %vm1542_vm7, %v744_v30 }
 0x365   : > { %v738_v31 = vpop.permute.xlu1 %737  ;;  %v1110_v41 = vpop.permute.xlu0 %1109 }
 0x366   : > { %v743_v32 = vsel %vm201_vm13, %v738_v31, %v740_v14 }
 0x367   : > { %1397 = vmatpush1.msk.msra.mxu0 %vm1547_vm8, %v743_v32 }
 0x368   : > { %1335 = vmatmul.mubr.msk.f32.vlgmr.msra.gmra.mxu0 %vm377_vm14, %v1332_v33 }
 0x369   : > { %v1148_v42 = vpop.permute.xlu1 %1147  ;;  %v1090_v43 = vpop.permute.xlu0 %1089 }
 0x36d   : > { %v1042_v44 = vpop.permute.xlu1 %1041  ;;  %v1062_v45 = vpop.permute.xlu0 %1061 }
 0x428   : > { %v986_v34 = vpop.f32.mrf.mxu0 }
 0x429   : > { %v1782_v35 = vmax.f32 %v986_v34, 0.0 }
 0x42a   : > { %v988_v37 = vpop.f32.mrf.mxu0 }
 0x42b   : > { %v992_v39 = vmax.f32 %v988_v37, 0.0  ;;  %1125 = vrot.lane.b32.xlu1 %v1782_v35, %s1421_s16  ;;  %1143 = vrot.lane.b32.xlu0 %v1782_v35, %s1419_s11 }
 0x42f   : > { %1085 = vrot.lane.b32.xlu1 %v1782_v35, %s1423_s18  ;;  %1105 = vrot.lane.b32.xlu0 %v1782_v35, %s1422_s17 }
 0x433   : > { %1043 = vrot.lane.b32.xlu1 %v1782_v35, %s1425_s20  ;;  %1063 = vrot.lane.b32.xlu0 %v1782_v35, %s1424_s19 }
 0x437   : > { %1127 = vrot.lane.b32.xlu1 %v992_v39, %s1421_s16  ;;  %1145 = vrot.lane.b32.xlu0 %v992_v39, %s1419_s11 }
 0x43b   : > { %1107 = vrot.lane.b32.xlu1 %v992_v39, %s1422_s17  ;;  %1025 = vrot.lane.b32.xlu0 %v1782_v35, %s1426_s21 }
 0x43f   : > { %1087 = vrot.lane.b32.xlu1 %v992_v39, %s1423_s18  ;;  %1005 = vrot.lane.b32.xlu0 %v1782_v35, %s1427_s22 }
 0x443   : > { %1065 = vrot.lane.b32.xlu1 %v992_v39, %s1424_s19  ;;  %1045 = vrot.lane.b32.xlu0 %v992_v39, %s1425_s20 }
 0x447   : > { %1027 = vrot.lane.b32.xlu1 %v992_v39, %s1426_s21  ;;  %1023 = vrot.lane.b32.xlu0 %v1418_v1, %s1426_s21 }
 0x44b   : > { %1007 = vrot.lane.b32.xlu1 %v992_v39, %s1427_s22 }
 0x44f   : > { %1003 = vrot.lane.b32.xlu1 %v1418_v1, %s1427_s22 }
 0x49d   : > { %v1126_v46 = vpop.permute.xlu1 %1125  ;;  %v1144_v48 = vpop.permute.xlu0 %1143 }
 0x4a1   : > { %v1086_v49 = vpop.permute.xlu1 %1085  ;;  %v1106_v4 = vpop.permute.xlu0 %1105 }
 0x4a5   : > { %v1044_v3 = vpop.permute.xlu1 %1043  ;;  %v1064_v51 = vpop.permute.xlu0 %1063 }
 0x4a6   : > { %v1047_v52 = vsel %vm241_vm11, %v1042_v44, %v1044_v3  ;;  %v1067_v53 = vsel %vm262_vm10, %v1062_v45, %v1064_v51 }
 0x4a9   : > { %v1128_v54 = vpop.permute.xlu1 %1127  ;;  %v1146_v55 = vpop.permute.xlu0 %1145 }
 0x4aa   : > { %v1131_v1 = vsel %vm329_vm5, %v1126_v46, %v1128_v54  ;;  %v1132_v56 = vsel %vm329_vm5, %v1128_v54, %v1130_v40  ;;  %v1149_v57 = vsel %vm348_vm2, %v1144_v48, %v1146_v55  ;;  %v1150_v58 = vsel %vm348_vm2, %v1146_v55, %v1148_v42 }
 0x4ab   : > { %1398 = vmatprep.subr.msk.mxu1 %vm1527_vm3, %v1150_v58 }
 0x4ac   : > { %1399 = vmatpush1.msk.msra.mxu1 %vm1531_vm4, %v1149_v57 }
 0x4ad   : > { %v1108_v59 = vpop.permute.xlu1 %1107  ;;  %v1026_v60 = vpop.permute.xlu0 %1025  ;;  %1202 = vmatprep.subr.mxu1 %v1132_v56 }
 0x4ae   : > { %v1111_v61 = vsel %vm308_vm6, %v1106_v4, %v1108_v59  ;;  %v1112_v62 = vsel %vm308_vm6, %v1108_v59, %v1110_v41  ;;  %1203 = vmatpush1.msra.mxu1 %v1131_v1 }
 0x4af   : > { %1400 = vmatprep.subr.msk.mxu1 %vm1542_vm7, %v1112_v62 }
 0x4b0   : > { %1401 = vmatpush1.msk.msra.mxu1 %vm1547_vm8, %v1111_v61 }
 0x4b1   : > { %v1088_v63 = vpop.permute.xlu1 %1087  ;;  %v1006_v0 = vpop.permute.xlu0 %1005 }
 0x4b2   : > { %v1091_v2 = vsel %vm287_vm9, %v1086_v49, %v1088_v63  ;;  %v1092_v5 = vsel %vm287_vm9, %v1088_v63, %v1090_v43 }
 0x4b3   : > { %1402 = vmatprep.subr.msk.mxu1 %vm1527_vm3, %v1092_v5 }
 0x4b4   : > { %1403 = vmatpush1.msk.msra.mxu1 %vm1531_vm4, %v1091_v2 }
 0x4b5   : > { %v1066_v6 = vpop.permute.xlu1 %1065  ;;  %v1046_v7 = vpop.permute.xlu0 %1045  ;;  %1208 = vmatprep.subr.mxu1 %v992_v39 }
 0x4b6   : > { %v1068_v8 = vsel %vm262_vm10, %v1064_v51, %v1066_v6  ;;  %v1048_v9 = vsel %vm241_vm11, %v1044_v3, %v1046_v7  ;;  %1209 = vmatpush1.msra.mxu1 %v1782_v35 }
 0x4b7   : > { %1404 = vmatprep.subr.msk.mxu1 %vm1542_vm7, %v1068_v8 }
 0x4b8   : > { %1405 = vmatpush1.msk.msra.mxu1 %vm1547_vm8, %v1067_v53 }
 0x4b9   : > { %v1028_v10 = vpop.permute.xlu1 %1027  ;;  %v1024_v11 = vpop.permute.xlu0 %1023  ;;  %1406 = vmatprep.subr.msk.mxu1 %vm1527_vm3, %v1048_v9 }
 0x4ba   : > { %v1030_v14 = vsel %vm222_vm12, %v1026_v60, %v1028_v10  ;;  %v1029_v15 = vsel %vm222_vm12, %v1024_v11, %v1026_v60  ;;  %1407 = vmatpush1.msk.msra.mxu1 %vm1531_vm4, %v1047_v52 }
 0x4bb   : > { %1214 = vmatprep.subr.mxu1 %v1030_v14 }
 0x4bc   : > { %1215 = vmatpush1.msra.mxu1 %v1029_v15 }
 0x4bd   : > { %v1008_v16 = vpop.permute.xlu1 %1007 }
 0x4be   : > { %v1010_v17 = vsel %vm201_vm13, %v1006_v0, %v1008_v16 }
 0x4bf   : > { %1408 = vmatprep.subr.msk.mxu1 %vm1542_vm7, %v1010_v17 }
 0x4c1   : > { %v1004_v18 = vpop.permute.xlu1 %1003 }
 0x4c2   : > { %v1009_v19 = vsel %vm201_vm13, %v1004_v18, %v1006_v0 }
 0x4c3   : > { %1409 = vmatpush1.msk.msra.mxu1 %vm1547_vm8, %v1009_v19 }
 0x4c4   : > { %1339 = vmatmul.mubr.msk.f32.vlgmr.msra.gmra.mxu1 %vm377_vm14, %v1336_v20 }
 0x584   : > { %v1252_v12 = vpop.f32.mrf.mxu1 }
 0x585   : > { %v1257_v13 = vadd.f32 %v1252_v12, %v1681_v47 }
 0x586   : > { %v1254_v23 = vpop.f32.mrf.mxu1 }
 0x587   : > { %1259 = vst [vmem:[%s143_s5] sm:$0xff] %v1257_v13  ;;  %v1258_v21 = vadd.f32 %v1254_v23, %v1698_v50 }
 0x589   : > { %1260 = vst [vmem:[%s143_s5 + $0x8] sm:$0xff] %v1258_v21 }
 0x58a PF: > { %s12_s9 = sadd.s32 1, %s1416_s9  }
 0x58b   : > { %p9_p4 = scmp.ge.s32.totalorder %s12_s9, 4  }
 0x58d   :  { %11 = sbr.rel (!%p9_p4) target bundleno = 1 (0x1), region = 62 }

</bundles_post_ra>
